<compile_context>
chip_gen: v7x
topology: tpu7x:2x2x1
jax: 0.10.0
libtpu: 0.0.40
codegen_flags: <defaults>
</compile_context>

<pallas_src>
import functools

import numpy as np
import jax
import jax.numpy as jnp
from jax.experimental import pallas as pl
from jax.experimental.pallas import tpu as pltpu


# ----------------------------------------------------------------------------
# helpers
# ----------------------------------------------------------------------------
def _interp_matrix(in_size, out_size):
    """1-D bilinear interpolation matrix (out, in), align_corners=True."""
    m = np.zeros((out_size, in_size), np.float32)
    scale = 0.0 if out_size == 1 else (in_size - 1) / (out_size - 1)
    for i in range(out_size):
        src = i * scale
        i0 = min(int(np.floor(src)), in_size - 1)
        i1 = min(i0 + 1, in_size - 1)
        f = src - i0
        m[i, i0] += 1.0 - f
        m[i, i1] += f
    return m


def fold_bn(bn, eps=1e-5):
    scale = bn["gamma"] * jax.lax.rsqrt(bn["var"] + eps)
    bias = bn["beta"] - bn["mean"] * scale
    return scale, bias


def _shift_rows(x, off):
    """y[j] = x[(j + off) % L] along axis 0 (flattened-pixel column shift).

    Wrapped rows only ever land in discarded / zeroed pad columns (Wp >= W+2
    with zero pad cols), so this implements the 3x3-conv column taps."""
    if off == 0:
        return x
    return jnp.concatenate([x[off:], x[:off]], axis=0)


# ----------------------------------------------------------------------------
# K0: column interpolation of the ASPP features (w -> Wp, zero-padded cols)
# ----------------------------------------------------------------------------
def _upsample_cols_kernel(aspp_ref, wwp_ref, o_ref):
    h = aspp_ref.shape[1]
    for a in range(h):                      # h is small; unrolled 2-D matmuls
        o_ref[0, a] = jnp.dot(wwp_ref[...], aspp_ref[0, a],
                              preferred_element_type=jnp.float32
                              ).astype(o_ref.dtype)


# ----------------------------------------------------------------------------
# K1: fused row-upsample + 3x3 conv (48-path pre-stacked + 256-path) + BN1+ReLU
# ----------------------------------------------------------------------------
def _conv1_kernel(ps_ref, colup_ref, wh_ref, w1l_ref, w1u_ref, s1_ref, b1_ref,
                  y1_ref, *, H, W, TH, Wp, C):
    r = pl.program_id(1)
    RZ = TH + 4                       # input rows for this tile (2-row halo)
    RO = TH + 2                       # output rows (1-row halo kept for K2)
    PIXZ = RZ * Wp
    PIXO = RO * Wp
    h = colup_ref.shape[1]
    CL = w1l_ref.shape[1]             # 3 * 48 stacked low-path channels

    # 1) x4 bilinear row interpolation of the column-interpolated ASPP
    #    features.  bf16 MXU operands, f32 accumulation; zero rows of wh
    #    encode the out-of-image rows (conv zero padding).
    cu = colup_ref[0].reshape(h, Wp * C)                              # (h, Wp*C)
    up = jnp.dot(wh_ref[0], cu, preferred_element_type=jnp.float32)   # (RZ, Wp*C)
    up = up.reshape(RZ, Wp, C).reshape(PIXZ, C)                       # pixel-major

    # 2) the three column-shifted variants (one per kx), cast to bf16 once.
    up_k = [_shift_rows(up, kx - 1).astype(jnp.bfloat16) for kx in range(3)]

    # 3) low-level path: the projected low-level features arrive already
    #    kx-stacked host-side (144 = 3*48 channels), so the nine K=48 taps
    #    collapse into three aligned-row-slice matmuls of K=144.
    ps = ps_ref[0, 0].reshape(PIXZ, CL)                               # bf16
    acc = jnp.dot(ps[0:PIXO], w1l_ref[0], preferred_element_type=jnp.float32)
    for ky in (1, 2):
        acc = acc + jnp.dot(ps[ky * Wp:ky * Wp + PIXO], w1l_ref[ky],
                            preferred_element_type=jnp.float32)

    # 4) ASPP path: 9 taps of K=256, grouped per kx; pure jnp-value
    #    accumulation (no VMEM-scratch read-modify-write).
    for kx in range(3):
        u = up_k[kx]
        part = jnp.dot(u[0:PIXO], w1u_ref[kx],
                       preferred_element_type=jnp.float32)
        part = part + jnp.dot(u[Wp:Wp + PIXO], w1u_ref[3 + kx],
                              preferred_element_type=jnp.float32)
        part = part + jnp.dot(u[2 * Wp:2 * Wp + PIXO], w1u_ref[6 + kx],
                              preferred_element_type=jnp.float32)
        acc = acc + part

    # 5) folded BN + ReLU (f32), then zero halo rows / pad columns outside the
    #    image with a separable (row x col) mask so K2 can use them directly
    #    as its zero padding.
    y = jnp.maximum(acc * s1_ref[...] + b1_ref[...], 0.0).reshape(RO, Wp, C)
    row = jax.lax.broadcasted_iota(jnp.int32, (RO, 1, 1), 0) + (r * TH - 1)
    col = jax.lax.broadcasted_iota(jnp.int32, (1, Wp, 1), 1)
    mask = (((row >= 0) & (row < H)).astype(jnp.float32) *
            (col < W).astype(jnp.float32))
    y1_ref[0, 0] = (y * mask).astype(jnp.bfloat16)


# ----------------------------------------------------------------------------
# K2: fused 3x3 conv (256->256) + BN2 + ReLU + 1x1 classifier (lane-dense out)
# ----------------------------------------------------------------------------
def _conv2_kernel(y1_ref, w2_ref, s2_ref, b2_ref, cw_ref, cb_ref, out_ref,
                  *, W, TH, Wp, C):
    RZ = TH + 2
    PIXZ = RZ * Wp
    PIXO = TH * Wp

    z = y1_ref[0, 0].astype(jnp.float32).reshape(PIXZ, C)
    z_k = [_shift_rows(z, kx - 1).astype(jnp.bfloat16) for kx in range(3)]

    acc = None
    for kx in range(3):
        zz = z_k[kx]
        part = jnp.dot(zz[0:PIXO], w2_ref[kx],
                       preferred_element_type=jnp.float32)
        part = part + jnp.dot(zz[Wp:Wp + PIXO], w2_ref[3 + kx],
                              preferred_element_type=jnp.float32)
        part = part + jnp.dot(zz[2 * Wp:2 * Wp + PIXO], w2_ref[6 + kx],
                              preferred_element_type=jnp.float32)
        acc = part if acc is None else acc + part

    # BN + ReLU (f32) then the fused 1x1 classifier into a 128-channel-padded,
    # lane-dense bf16 output block (sliced back to out_channels in the wrapper).
    y = jnp.maximum(acc * s2_ref[...] + b2_ref[...], 0.0)
    out = jnp.dot(y.astype(jnp.bfloat16), cw_ref[...],
                  preferred_element_type=jnp.float32) + cb_ref[...]
    Cp = cw_ref.shape[1]
    out_ref[0] = out.reshape(TH, Wp, Cp)[:, :W, :].astype(out_ref.dtype)


# ----------------------------------------------------------------------------
# parameters
# ----------------------------------------------------------------------------
def init_params(key, out_channels):
    ks = jax.random.split(key, 14)
    nrm = lambda k, shape, s=0.05: jax.random.normal(k, shape, jnp.float32) * s
    bn = lambda kg, kb, km, kv, c: dict(
        gamma=1.0 + 0.1 * jax.random.normal(kg, (c,), jnp.float32),
        beta=nrm(kb, (c,)),
        mean=nrm(km, (c,)),
        var=0.5 + jnp.abs(jax.random.normal(kv, (c,), jnp.float32)) * 0.5,
    )
    return {
        "proj_w": nrm(ks[0], (256, 48)),
        "proj_b": nrm(ks[1], (48,)),
        "conv1_w": nrm(ks[2], (3, 3, 256 + 48, 256)),   # HWIO
        "bn1": bn(ks[3], ks[4], ks[5], ks[6], 256),
        "conv2_w": nrm(ks[7], (3, 3, 256, 256)),         # HWIO
        "bn2": bn(ks[8], ks[9], ks[10], ks[11], 256),
        "cls_w": nrm(ks[12], (256, out_channels)),
        "cls_b": nrm(ks[13], (out_channels,)),
    }


# ----------------------------------------------------------------------------
# forward
# ----------------------------------------------------------------------------
def deeplab_decoder_forward(low_feat, aspp_feat, params, row_tile=None):
    # NCHW (PyTorch) -> NHWC for the kernels
    low = jnp.transpose(low_feat, (0, 2, 3, 1)).astype(jnp.float32)
    aspp = jnp.transpose(aspp_feat, (0, 2, 3, 1)).astype(jnp.float32)
    N, H, W, _ = low.shape
    _, h, w, _ = aspp.shape
    assert H == 4 * h and W == 4 * w
    C = 256
    CL = 3 * 48                                           # kx-stacked low path
    out_c = params["cls_w"].shape[1]
    Cp = max(128, ((out_c + 127) // 128) * 128)           # lane-dense classifier

    # Row tile: prefer 32 rows (halo overhead 12.5% DMA / 6% y1 traffic) while
    # keeping the grid non-degenerate so both v7x TensorCores get grid steps.
    if row_tile is not None:
        TH = row_tile
    else:
        cands = [t for t in (32, 16, 8) if H % t == 0] or [H]
        TH = cands[0]
        if N * (H // TH) < 2:
            for t in cands:
                if N * (H // t) >= 2:
                    TH = t
                    break
    assert H % TH == 0
    n_rt = H // TH
    RZ, RO = TH + 4, TH + 2
    # Padded width: >= W+2 (cyclic column shifts wrap only into zero pad cols)
    # and a multiple of 16 so bf16 row slices at ky*Wp stay layout-aligned.
    Wp = ((W + 2 + 15) // 16) * 16

    # Interpolation operators; zero rows/cols double as the 3x3 conv zero pad.
    Wh = _interp_matrix(h, H)
    Ww = _interp_matrix(w, W)
    wwp_np = np.zeros((Wp, w), np.float32)
    wwp_np[:W] = Ww
    wh_np = np.zeros((n_rt, RZ, h), np.float32)
    for r in range(n_rt):
        for i in range(RZ):
            g = r * TH - 2 + i
            if 0 <= g < H:
                wh_np[r, i] = Wh[g]
    wwp = jnp.asarray(wwp_np).astype(jnp.bfloat16)
    wh_t = jnp.asarray(wh_np).astype(jnp.bfloat16)

    # Parameters: bf16 MXU operands, f32 folded-BN / bias epilogues.
    pw = params["proj_w"].astype(jnp.bfloat16)                       # (256, 48)
    pb = params["proj_b"].astype(jnp.float32)
    w1 = params["conv1_w"]                                           # (3,3,304,256)
    w1l = w1[:, :, :48, :].reshape(3, CL, C).astype(jnp.bfloat16)    # kx-stacked
    w1u = w1[:, :, 48:, :].reshape(9, C, C).astype(jnp.bfloat16)
    s1, b1 = fold_bn(params["bn1"])
    s1 = s1.reshape(1, C).astype(jnp.float32)
    b1 = b1.reshape(1, C).astype(jnp.float32)
    w2 = params["conv2_w"].reshape(9, C, C).astype(jnp.bfloat16)
    s2, b2 = fold_bn(params["bn2"])
    s2 = s2.reshape(1, C).astype(jnp.float32)
    b2 = b2.reshape(1, C).astype(jnp.float32)
    cw = jnp.pad(params["cls_w"], ((0, 0), (0, Cp - out_c))).astype(jnp.bfloat16)
    cb = jnp.pad(params["cls_b"], ((0, Cp - out_c),)).reshape(1, Cp).astype(jnp.float32)

    # Host-side: 1x1 projection (256->48, ~1.7% of FLOPs) and kx-stacking of
    # its three column taps, zero outside the image (the conv zero padding):
    #   ps_full[n, y, x, kx*48:(kx+1)*48] = proj[n, y-2, x+kx-1]
    # so conv1's nine K=48 taps become three aligned K=144 matmuls in K1.
    proj = jnp.einsum("nhwc,cd->nhwd", low.astype(jnp.bfloat16), pw,
                      preferred_element_type=jnp.float32) + pb       # (N,H,W,48)
    projpad = jnp.pad(proj, ((0, 0), (2, 2), (1, Wp - W + 1), (0, 0)))
    ps_full = jnp.concatenate(
        [projpad[:, :, kx:kx + Wp, :] for kx in range(3)],
        axis=-1).astype(jnp.bfloat16)                                # (N,H+4,Wp,144)
    # Overlapped (2-row halo) row tiles so a plain BlockSpec auto-pipelines
    # (double-buffers) the fetch instead of a hand-rolled single-buffered DMA.
    ps_tiles = jnp.stack([ps_full[:, r * TH:r * TH + RZ] for r in range(n_rt)],
                         axis=1)                                     # (N,n_rt,RZ,Wp,144)

    def _limit(buf_bytes, temp_bytes):
        # double-buffered pipeline blocks + explicit temporaries, 25% headroom,
        # capped at 48 MiB so it stays inside v7x's 64 MiB per-TC VMEM.
        need = 2 * buf_bytes + temp_bytes
        return int(min(48 * 2 ** 20, max(16 * 2 ** 20, int(1.25 * need))))

    # ---- K0: column interpolation of ASPP (low-res rows, cheap, bf16) ----
    colup = pl.pallas_call(
        _upsample_cols_kernel,
        out_shape=jax.ShapeDtypeStruct((N, h, Wp, C), jnp.bfloat16),
        grid=(N,),
        in_specs=[pl.BlockSpec((1, h, w, C), lambda n: (n, 0, 0, 0)),
                  pl.BlockSpec((Wp, w), lambda n: (0, 0))],
        out_specs=pl.BlockSpec((1, h, Wp, C), lambda n: (n, 0, 0, 0)),
        compiler_params=pltpu.CompilerParams(dimension_semantics=("parallel",)),
    )(aspp.astype(jnp.bfloat16), wwp)

    # ---- K1: fused row-upsample + 3x3 conv (304->256) + BN1 + ReLU ----
    k1_buf = (RZ * Wp * CL * 2 + h * Wp * C * 2 + RZ * h * 2
              + 3 * CL * C * 2 + 9 * C * C * 2 + 4 * C * 4
              + RO * Wp * C * 2)
    k1_tmp = (RZ * Wp * C * 4 * 3          # up f32 + shift copies
              + RZ * Wp * C * 2 * 3        # 3 bf16 shifted variants
              + RO * Wp * C * 4 * 2)       # f32 accumulator + partial
    k1 = functools.partial(_conv1_kernel, H=H, W=W, TH=TH, Wp=Wp, C=C)
    y1 = pl.pallas_call(
        k1,
        out_shape=jax.ShapeDtypeStruct((N, n_rt, RO, Wp, C), jnp.bfloat16),
        grid_spec=pltpu.PrefetchScalarGridSpec(
            num_scalar_prefetch=0,
            grid=(N, n_rt),
            in_specs=[
                pl.BlockSpec((1, 1, RZ, Wp, CL), lambda n, r: (n, r, 0, 0, 0)),
                pl.BlockSpec((1, h, Wp, C), lambda n, r: (n, 0, 0, 0)),
                pl.BlockSpec((1, RZ, h), lambda n, r: (r, 0, 0)),
                pl.BlockSpec((3, CL, C), lambda n, r: (0, 0, 0)),
                pl.BlockSpec((9, C, C), lambda n, r: (0, 0, 0)),
                pl.BlockSpec((1, C), lambda n, r: (0, 0)),
                pl.BlockSpec((1, C), lambda n, r: (0, 0)),
            ],
            out_specs=pl.BlockSpec((1, 1, RO, Wp, C),
                                   lambda n, r: (n, r, 0, 0, 0)),
        ),
        compiler_params=pltpu.CompilerParams(
            dimension_semantics=("parallel", "parallel"),
            vmem_limit_bytes=_limit(k1_buf, k1_tmp)),
    )(ps_tiles, colup, wh_t, w1l, w1u, s1, b1)

    # ---- K2: fused 3x3 conv + BN2 + ReLU + 1x1 classifier (bf16 out) ----
    k2_buf = (RO * Wp * C * 2 + 9 * C * C * 2 + 2 * C * 4
              + C * Cp * 2 + Cp * 4 + TH * W * Cp * 2)
    k2_tmp = (RO * Wp * C * 4 * 2          # z f32 + shift copy
              + RO * Wp * C * 2 * 3        # 3 bf16 shifted variants
              + TH * Wp * C * 4 * 2        # f32 accumulator + partial
              + TH * Wp * Cp * 4)          # classifier f32 temp
    k2 = functools.partial(_conv2_kernel, W=W, TH=TH, Wp=Wp, C=C)
    outp = pl.pallas_call(
        k2,
        out_shape=jax.ShapeDtypeStruct((N, H, W, Cp), jnp.bfloat16),
        grid_spec=pltpu.PrefetchScalarGridSpec(
            num_scalar_prefetch=0,
            grid=(N, n_rt),
            in_specs=[
                pl.BlockSpec((1, 1, RO, Wp, C), lambda n, r: (n, r, 0, 0, 0)),
                pl.BlockSpec((9, C, C), lambda n, r: (0, 0, 0)),
                pl.BlockSpec((1, C), lambda n, r: (0, 0)),
                pl.BlockSpec((1, C), lambda n, r: (0, 0)),
                pl.BlockSpec((C, Cp), lambda n, r: (0, 0)),
                pl.BlockSpec((1, Cp), lambda n, r: (0, 0)),
            ],
            out_specs=pl.BlockSpec((1, TH, W, Cp), lambda n, r: (n, r, 0, 0)),
        ),
        compiler_params=pltpu.CompilerParams(
            dimension_semantics=("parallel", "parallel"),
            vmem_limit_bytes=_limit(k2_buf, k2_tmp)),
    )(y1, w2, s2, b2, cw, cb)

    # TODO(synk): Dropout(0.1) implemented as eval-mode identity (no RNG drop).
    out = outp[..., :out_c].astype(jnp.float32)
    return jnp.transpose(out, (0, 3, 1, 2))                          # back to NCHW


# ----------------------------------------------------------------------------
# pure-JAX reference (f32) for a sanity check
# ----------------------------------------------------------------------------
def reference_forward(low_feat, aspp_feat, params):
    low = jnp.transpose(low_feat, (0, 2, 3, 1)).astype(jnp.float32)
    aspp = jnp.transpose(aspp_feat, (0, 2, 3, 1)).astype(jnp.float32)
    low_p = low @ params["proj_w"] + params["proj_b"]
    h, w = aspp.shape[1:3]
    Wh = jnp.asarray(_interp_matrix(h, 4 * h))
    Ww = jnp.asarray(_interp_matrix(w, 4 * w))
    aspp_up = jnp.einsum("ia,jb,nabc->nijc", Wh, Ww, aspp)
    x = jnp.concatenate([low_p, aspp_up], axis=-1)

    def conv_bn_relu(x, wgt, bn):
        y = jax.lax.conv_general_dilated(
            x, wgt, (1, 1), "SAME",
            dimension_numbers=("NHWC", "HWIO", "NHWC"))
        s, b = fold_bn(bn)
        return jnp.maximum(y * s + b, 0.0)

    x = conv_bn_relu(x, params["conv1_w"], params["bn1"])
    x = conv_bn_relu(x, params["conv2_w"], params["bn2"])
    out = x @ params["cls_w"] + params["cls_b"]
    return jnp.transpose(out, (0, 3, 1, 2))


if __name__ == "__main__":
    key = jax.random.PRNGKey(0)
    k_low, k_aspp, k_par = jax.random.split(key, 3)

    N, H, W = 2, 16, 16          # low-level feature spatial size
    h, w = H // 4, W // 4        # ASPP feature is 4x smaller spatially
    out_channels = 8

    low_feat = jax.random.normal(k_low, (N, 256, H, W), jnp.float32)
    aspp_feat = jax.random.normal(k_aspp, (N, 256, h, w), jnp.float32)
    params = init_params(k_par, out_channels)

    out = deeplab_decoder_forward(low_feat, aspp_feat, params)
    out = jax.block_until_ready(out)
    assert out.shape == (N, out_channels, H, W), out.shape

    ref = jax.block_until_ready(reference_forward(low_feat, aspp_feat, params))
    max_err = float(jnp.max(jnp.abs(out - ref)))
    assert jnp.allclose(out, ref, rtol=5e-2, atol=8e-2), max_err

    print("KERNEL_OK")
</pallas_src>

<mosaic_0001>
module attributes {stable_mosaic.version = 11 : i64} {
  func.func @_upsample_cols_kernel(%arg0: i32, %arg1: memref<1x4x4x256xbf16, #tpu.memory_space<vmem>>, %arg2: memref<32x4xbf16, #tpu.memory_space<vmem>>, %arg3: memref<1x4x32x256xbf16, #tpu.memory_space<vmem>>) attributes {dimension_semantics = [#tpu.dimension_semantics<parallel>], iteration_bounds = array<i64: 2>, scalar_prefetch = 0 : i64, scratch_operands = 0 : i64, tpu.core_type = #tpu.core_type<tc>, window_params = [{transform_indices = @transform_0, window_bounds = array<i64: 1, 4, 4, 256>}, {pipeline_mode = #tpu.pipeline_mode<synchronous>, transform_indices = @transform_1, window_bounds = array<i64: 32, 4>}, {transform_indices = @transform_2, window_bounds = array<i64: 1, 4, 32, 256>}]} {
    %c0 = arith.constant 0 : index
    %c0_0 = arith.constant 0 : index
    %0 = vector.load %arg2[%c0, %c0_0] : memref<32x4xbf16, #tpu.memory_space<vmem>>, vector<32x4xbf16>
    %c0_1 = arith.constant 0 : index
    %c0_2 = arith.constant 0 : index
    %c0_3 = arith.constant 0 : index
    %c0_4 = arith.constant 0 : index
    %1 = vector.load %arg1[%c0_1, %c0_2, %c0_3, %c0_4] : memref<1x4x4x256xbf16, #tpu.memory_space<vmem>>, vector<1x1x4x256xbf16>
    %2 = vector.shape_cast %1 : vector<1x1x4x256xbf16> to vector<4x256xbf16>
    %cst = arith.constant dense<0.000000e+00> : vector<32x256xf32>
    %3 = tpu.matmul %0, %2, %cst {dimension_numbers = #tpu.dot_dimension_numbers<[1], [0], [0], [1], [0, 0, 1, 1], [], []>} : vector<32x4xbf16>, vector<4x256xbf16>, vector<32x256xf32> -> vector<32x256xf32>
    %4 = arith.truncf %3 : vector<32x256xf32> to vector<32x256xbf16>
    %c0_5 = arith.constant 0 : index
    %c0_6 = arith.constant 0 : index
    %c0_7 = arith.constant 0 : index
    %c0_8 = arith.constant 0 : index
    %5 = vector.load %arg3[%c0_5, %c0_6, %c0_7, %c0_8] : memref<1x4x32x256xbf16, #tpu.memory_space<vmem>>, vector<1x1x32x256xbf16>
    %6 = vector.shape_cast %5 : vector<1x1x32x256xbf16> to vector<32x256xbf16>
    %7 = vector.shape_cast %4 : vector<32x256xbf16> to vector<1x1x32x256xbf16>
    tpu.vector_store %arg3[%c0_5, %c0_6, %c0_7, %c0_8], %7 {strides = array<i32>} : memref<1x4x32x256xbf16, #tpu.memory_space<vmem>>, vector<1x1x32x256xbf16>,
    %c0_9 = arith.constant 0 : index
    %c0_10 = arith.constant 0 : index
    %8 = vector.load %arg2[%c0_9, %c0_10] : memref<32x4xbf16, #tpu.memory_space<vmem>>, vector<32x4xbf16>
    %c0_11 = arith.constant 0 : index
    %c1 = arith.constant 1 : index
    %c0_12 = arith.constant 0 : index
    %c0_13 = arith.constant 0 : index
    %9 = vector.load %arg1[%c0_11, %c1, %c0_12, %c0_13] : memref<1x4x4x256xbf16, #tpu.memory_space<vmem>>, vector<1x1x4x256xbf16>
    %10 = vector.shape_cast %9 : vector<1x1x4x256xbf16> to vector<4x256xbf16>
    %cst_14 = arith.constant dense<0.000000e+00> : vector<32x256xf32>
    %11 = tpu.matmul %8, %10, %cst_14 {dimension_numbers = #tpu.dot_dimension_numbers<[1], [0], [0], [1], [0, 0, 1, 1], [], []>} : vector<32x4xbf16>, vector<4x256xbf16>, vector<32x256xf32> -> vector<32x256xf32>
    %12 = arith.truncf %11 : vector<32x256xf32> to vector<32x256xbf16>
    %c0_15 = arith.constant 0 : index
    %c1_16 = arith.constant 1 : index
    %c0_17 = arith.constant 0 : index
    %c0_18 = arith.constant 0 : index
    %13 = vector.load %arg3[%c0_15, %c1_16, %c0_17, %c0_18] : memref<1x4x32x256xbf16, #tpu.memory_space<vmem>>, vector<1x1x32x256xbf16>
    %14 = vector.shape_cast %13 : vector<1x1x32x256xbf16> to vector<32x256xbf16>
    %15 = vector.shape_cast %12 : vector<32x256xbf16> to vector<1x1x32x256xbf16>
    tpu.vector_store %arg3[%c0_15, %c1_16, %c0_17, %c0_18], %15 {strides = array<i32>} : memref<1x4x32x256xbf16, #tpu.memory_space<vmem>>, vector<1x1x32x256xbf16>,
    %c0_19 = arith.constant 0 : index
    %c0_20 = arith.constant 0 : index
    %16 = vector.load %arg2[%c0_19, %c0_20] : memref<32x4xbf16, #tpu.memory_space<vmem>>, vector<32x4xbf16>
    %c0_21 = arith.constant 0 : index
    %c2 = arith.constant 2 : index
    %c0_22 = arith.constant 0 : index
    %c0_23 = arith.constant 0 : index
    %17 = vector.load %arg1[%c0_21, %c2, %c0_22, %c0_23] : memref<1x4x4x256xbf16, #tpu.memory_space<vmem>>, vector<1x1x4x256xbf16>
    %18 = vector.shape_cast %17 : vector<1x1x4x256xbf16> to vector<4x256xbf16>
    %cst_24 = arith.constant dense<0.000000e+00> : vector<32x256xf32>
    %19 = tpu.matmul %16, %18, %cst_24 {dimension_numbers = #tpu.dot_dimension_numbers<[1], [0], [0], [1], [0, 0, 1, 1], [], []>} : vector<32x4xbf16>, vector<4x256xbf16>, vector<32x256xf32> -> vector<32x256xf32>
    %20 = arith.truncf %19 : vector<32x256xf32> to vector<32x256xbf16>
    %c0_25 = arith.constant 0 : index
    %c2_26 = arith.constant 2 : index
    %c0_27 = arith.constant 0 : index
    %c0_28 = arith.constant 0 : index
    %21 = vector.load %arg3[%c0_25, %c2_26, %c0_27, %c0_28] : memref<1x4x32x256xbf16, #tpu.memory_space<vmem>>, vector<1x1x32x256xbf16>
    %22 = vector.shape_cast %21 : vector<1x1x32x256xbf16> to vector<32x256xbf16>
    %23 = vector.shape_cast %20 : vector<32x256xbf16> to vector<1x1x32x256xbf16>
    tpu.vector_store %arg3[%c0_25, %c2_26, %c0_27, %c0_28], %23 {strides = array<i32>} : memref<1x4x32x256xbf16, #tpu.memory_space<vmem>>, vector<1x1x32x256xbf16>,
    %c0_29 = arith.constant 0 : index
    %c0_30 = arith.constant 0 : index
    %24 = vector.load %arg2[%c0_29, %c0_30] : memref<32x4xbf16, #tpu.memory_space<vmem>>, vector<32x4xbf16>
    %c0_31 = arith.constant 0 : index
    %c3 = arith.constant 3 : index
    %c0_32 = arith.constant 0 : index
    %c0_33 = arith.constant 0 : index
    %25 = vector.load %arg1[%c0_31, %c3, %c0_32, %c0_33] : memref<1x4x4x256xbf16, #tpu.memory_space<vmem>>, vector<1x1x4x256xbf16>
    %26 = vector.shape_cast %25 : vector<1x1x4x256xbf16> to vector<4x256xbf16>
    %cst_34 = arith.constant dense<0.000000e+00> : vector<32x256xf32>
    %27 = tpu.matmul %24, %26, %cst_34 {dimension_numbers = #tpu.dot_dimension_numbers<[1], [0], [0], [1], [0, 0, 1, 1], [], []>} : vector<32x4xbf16>, vector<4x256xbf16>, vector<32x256xf32> -> vector<32x256xf32>
    %28 = arith.truncf %27 : vector<32x256xf32> to vector<32x256xbf16>
    %c0_35 = arith.constant 0 : index
    %c3_36 = arith.constant 3 : index
    %c0_37 = arith.constant 0 : index
    %c0_38 = arith.constant 0 : index
    %29 = vector.load %arg3[%c0_35, %c3_36, %c0_37, %c0_38] : memref<1x4x32x256xbf16, #tpu.memory_space<vmem>>, vector<1x1x32x256xbf16>
    %30 = vector.shape_cast %29 : vector<1x1x32x256xbf16> to vector<32x256xbf16>
    %31 = vector.shape_cast %28 : vector<32x256xbf16> to vector<1x1x32x256xbf16>
    tpu.vector_store %arg3[%c0_35, %c3_36, %c0_37, %c0_38], %31 {strides = array<i32>} : memref<1x4x32x256xbf16, #tpu.memory_space<vmem>>, vector<1x1x32x256xbf16>,
    return
  }
  func.func @transform_0(%arg0: i32) -> (i32, i32, i32, i32) {
    %c0_i32 = arith.constant 0 : i32
    %c0_i32_0 = arith.constant 0 : i32
    %c0_i32_1 = arith.constant 0 : i32
    %c0_i32_2 = arith.constant 0 : i32
    return %arg0, %c0_i32, %c0_i32_0, %c0_i32_1 : i32, i32, i32, i32
  }
  func.func @transform_1(%arg0: i32) -> (i32, i32) {
    %c0_i32 = arith.constant 0 : i32
    %c0_i32_0 = arith.constant 0 : i32
    %c0_i32_1 = arith.constant 0 : i32
    return %c0_i32, %c0_i32_0 : i32, i32
  }
  func.func @transform_2(%arg0: i32) -> (i32, i32, i32, i32) {
    %c0_i32 = arith.constant 0 : i32
    %c0_i32_0 = arith.constant 0 : i32
    %c0_i32_1 = arith.constant 0 : i32
    %c0_i32_2 = arith.constant 0 : i32
    return %arg0, %c0_i32, %c0_i32_0, %c0_i32_1 : i32, i32, i32, i32
  }
}

</mosaic_0001>

<bundles_post_ra>
// kernel: tpu_custom_call.1
= control target key start
LH: loop header
LB: loop body
LE: loop exit
PB: predicated region body
PF: predicated region fallthrough
CT: control target
= control target key end

     0   :  { %7 = vsyncpa [#allocation3], 0  ;;  %s1214_s0 = inlined_call_operand.hbm [shape: bf16[2,4,4,256], index: 0, kind: input, shape index: {}]   ;;  %s1215_s1 = inlined_call_operand.vmem [shape: bf16[32,4], index: 1, kind: input, shape index: {}]   ;;  %s1216_s2 = inlined_call_operand.hbm [shape: bf16[2,4,32,256], index: 2, kind: output, shape index: {}]  }
   0x1   :  { %9 = vsyncpa [#allocation3 + $0x1], 0 }
   0x2   :  { %10 = vsyncpa [#allocation4], 0 }
   0x3   :  { %12 = vsyncpa [#allocation4 + $0x1], 0  ;;  %s992_s9 = smov 0   ;;  %s994_s10 = smov 0  }
   0x4   :  { %s996_s11 = smov 0   ;;  %s998_s12 = smov 0  }
   0x5 LB: > { %s1013_s13 = sadd.s32 4294967295, %s968_s12   ;;  %s726_s14 = sadd.s32 4294967294, %s968_s12   ;;  %s968_s12 = sphi %s998_s12, %s1229_s12   ;;  %s964_s11 = sphi %s996_s11, %s1228_s11   ;;  %s960_s10 = sphi %s994_s10, %s1227_s10   ;;  %s956_s9 = sphi %s992_s9, %s1226_s9  }
   0x6   : > { %s1017_s15 = sadd.s32 1, %s968_s12   ;;  %s25_s16 = sadd.s32 1, %s964_s11 }
   0x7   : > { %s22_s17 = ssub.s32 %s968_s12, %s1017_s15  ;;  %p32_p0 = scmp.ne.s32.totalorder %s964_s11, %s960_s10 }
   0x8   : > { %p23_p1 = scmp.eq.s32.totalorder %s22_s17, 0  ;;  %p33_p2 = scmp.eq.s32.totalorder %s968_s12, 0 }
   0x9   : > { %p38_p3 = scmp.ne.s32.totalorder %s960_s10, %s956_s9  ;;  %p39_p4 = scmp.eq.s32.totalorder %s1013_s13, 0 }
   0xa   : > { %s1029_s18 = scalar_select %p23_p1, %s964_s11, %s25_s16  }
   0xb   : > { %p1031_p5 = por %p33_p2, %p32_p0  ;;  %p1035_p6 = por %p39_p4, %p38_p3 }
   0xc   : > { %p83_p7 = scmp.eq.s32.totalorder %s1013_s13, 1  ;;  %p89_p8 = scmp.eq.s32.totalorder %s726_s14, 1 }
   0xd   : > { %p825_p10 = scmp.lt.s32.totalorder %s968_s12, 2  ;;  %s112_s23 = sand.u32 1, %s964_s11  }
   0xe   : > { %p1042_p11 = por %p83_p7, %p32_p0  ;;  %p1046_p12 = por %p89_p8, %p38_p3 }
   0xf   : > { %s795_s24 = sshll.u32 %s968_s12, 8  ;;  %s729_s25 = sshll.u32 %s112_s23, 4 }
  0x10   : > { %s1220_s21 = scalar_select %p1042_p11, 1, 0 }
  0x11   : > { %s1221_s22 = scalar_select %p1046_p12, 1, 0 }
  0x12   : > { %s1055_s28 = scalar_lea.hbm %s1214_s0, %s795_s24  ;;  %s116_s29 = scalar_lea.vmem [#allocation2], %s729_s25 }
  0x13   : > { %s123_s30 = sshll.u32 %s116_s29, 4  ;;  %p1059_p13 = pnand %p825_p10, %p1031_p5  ;;  %s1063_s30 = int_to_ptr.vmem [resolvable:$true] %s123_s30 }
  0x14   : > { %s1065_s4 = scalar_lea.sflag [#allocation3], %s112_s23  ;;  %s872_s5 = scalar_lea.hbm %s1055_s28, 256 }
  0x15   : > { %p873_p0 = scmp.ne.s32.totalorder %s1055_s28, %s872_s5  ;;  %p874_p1 = pneg %p1059_p13 }
  0x16   : > { %s877_s8 = scalar_lea.hbm %s1214_s0, 512  ;;  %p878_p4 = scmp.lt.u32.totalorder %s1055_s28, %s1214_s0 }
  0x17   : > { %p875_p2 = pnand %p874_p1, %p873_p0  ;;  %p879_p5 = scmp.lt.u32.totalorder %s877_s8, %s872_s5 }
  0x18   : > { %p881_p8 = scmp.lt.u32.totalorder %s872_s5, %s1055_s28 }
  0x19   : > { %p876_p3 = pneg %p875_p2  ;;  %p880_p7 = por %p879_p5, %p878_p4 }
  0x1b   : > { %p882_p10 = por %p881_p8, %p880_p7 }
  0x1d   : > { %p883_p9 = pnand %p882_p10, %p876_p3 }
  0x1f   : > { %886 = shalt.err (!%p883_p9)
}
  0x20   : > { %s887_s17 = scalar_lea.vmem %s1063_s30, 256  ;;  %s970_s19 = smov [#allocation2]  }
  0x21   : > { %p888_p0 = scmp.ne.s32.totalorder %s1063_s30, %s887_s17  ;;  %s892_s23 = sshll.u32 %s970_s19, 4  ;;  %s893_s23 = int_to_ptr.vmem [resolvable:$false] %s892_s23 }
  0x22   : > { %s894_s24 = scalar_lea.vmem %s893_s23, 512  ;;  %p895_p11 = scmp.lt.s32.totalorder %s1063_s30, %s893_s23 }
  0x23   : > { %p890_p2 = pnand %p888_p0, %p874_p1  ;;  %p896_p4 = scmp.lt.s32.totalorder %s894_s24, %s887_s17 }
  0x25   : > { %p891_p12 = pneg %p890_p2  ;;  %p897_p5 = por %p896_p4, %p895_p11 }
  0x27   : > { %p898_p7 = pnand %p897_p5, %p891_p12 }
  0x29   : > { %901 = shalt.err (!%p898_p7)
}
  0x2a   : > { %s971_s25 = smov 64   ;;  %s972_s26 = smov 4  }
  0x2b   : > { %820 = dma.hbm_to_vmem [thread:$0]  (!%p1059_p13), %s1055_s28, 256, %s1063_s30, %s1065_s4, %s971_s25, %s971_s25, %s972_s26  }
  0x2c   : > { %p732_p9 = scmp.ge.s32.totalorder %s968_s12, 1  ;;  %p131_p1 = scmp.lt.s32.totalorder %s968_s12, 3 }
  0x2e   : > { %p132_p3 = pnand %p732_p9, %p131_p1 }
  0x2f   : > { %s1096_s27 = sand.u32 (!%p132_p3), 1, %s960_s10  }
  0x30   : > { %135 = sbr.rel (%p132_p3) target bundleno = 321 (0x141), region = 28  ;;  %s733_s29 = sshll.u32 (!%p132_p3), %s1096_s27, 4 }
  0x31   : > { %s138_s5 = scalar_lea.sflag (!%p132_p3), [#allocation3], %s1096_s27  ;;  %s141_s6 = scalar_lea.vmem (!%p132_p3), [#allocation2], %s733_s29 }
  0x37   : > { %947 = dma.done.wait (%p1035_p6), %s138_s5, 256  }
  0x38   : > { %949 = vsyncadd (%p1035_p6), %s138_s5, 4294967040  ;;  %v973_v0 = vmov 0   ;;  %vm194_vm0 = vcmask 1041408   ;;  %v864_v7 = vld [vmem:[%s1215_s1] sm:$0xff]   ;;  %vm187_vm1 = vcmask 31744   ;;  %v866_v15 = vld [vmem:[%s1215_s1 + $0x8] sm:$0xff]  }
  0x39   : > { %233 = vmatprep.mubr.bf16.mxu0 %v973_v0  ;;  %351 = vmatprep.mubr.bf16.mxu1 %v973_v0  ;;  %v737_v1 = vld.sshfl [vmem:[%s141_s6] sm:$0x33 pattern:$0x76325410]  ;;  %v867_v16 = vld [vmem:[%s1215_s1 + $0x8] sm:$0xff]   ;;  %s734_s5 = sshll.u32 %s1096_s27, 7 }
  0x3a   : > { %v186_v2 = vcombine.high %v737_v1, %v737_v1  ;;  %v748_v3 = vld.sshfl [vmem:[%s141_s6 + $0x4] sm:$0x33 pattern:$0x76325410]  ;;  %v196_v4 = vsel %vm194_vm0, %v737_v1, 0  ;;  %v870_v19 = vld [vmem:[%s1215_s1 + $0x8] sm:$0xff]  }
  0x3b   : > { %v306_v5 = vcombine.high %v748_v3, %v748_v3  ;;  %v314_v6 = vsel %vm194_vm0, %v748_v3, 0  ;;  %v763_v8 = vld.sshfl [vmem:[%s141_s6 + $0x8] sm:$0x33 pattern:$0x76325410]  ;;  %v865_v9 = vld [vmem:[%s1215_s1] sm:$0xff]  }
  0x3c   : > { %738 = vmatprep.subr.msk.bf16.mxu0 %vm194_vm0, %v186_v2  ;;  %v425_v10 = vcombine.high %v763_v8, %v763_v8  ;;  %v778_v11 = vld.sshfl [vmem:[%s141_s6 + $0xc] sm:$0x33 pattern:$0x76325410]  ;;  %v433_v13 = vsel %vm194_vm0, %v763_v8, 0  ;;  %v868_v17 = vld [vmem:[%s1215_s1] sm:$0xff]  }
  0x3d   : > { %749 = vmatprep.subr.msk.bf16.mxu1 %vm194_vm0, %v306_v5  ;;  %202 = vmatpush1.bf16.msra.mxu0 %v196_v4  ;;  %v544_v12 = vcombine.high %v778_v11, %v778_v11  ;;  %v552_v14 = vsel %vm194_vm0, %v778_v11, 0  ;;  %v869_v18 = vld [vmem:[%s1215_s1] sm:$0xff]   ;;  %v871_v20 = vld [vmem:[%s1215_s1 + $0x8] sm:$0xff]   ;;  %s1145_s6 = scalar_lea.vmem [#allocation5], %s734_s5  ;;  %s812_s28 = sshll.u32 %s1013_s13, 11 }
  0x3e   : > { %320 = vmatpush1.bf16.msra.mxu1 %v314_v6  ;;  %764 = vmatprep.subr.msk.bf16.mxu0 %vm194_vm0, %v425_v10  ;;  %s653_s30 = sshll.u32 %s1145_s6, 4  ;;  %s1165_s4 = scalar_lea.hbm %s1216_s2, %s812_s28  ;;  %s1167_s30 = int_to_ptr.vmem [resolvable:$true] %s653_s30 }
  0x3f   : > { %779 = vmatprep.subr.msk.bf16.mxu1 %vm194_vm0, %v544_v12  ;;  %s640_s13 = scalar_lea.sflag [#allocation4], %s1096_s27  ;;  %s902_s7 = scalar_lea.vmem %s1167_s30, 2048 }
  0x40   : > { %739 = vmatmul.mubr.msk.bf16.vlgmr.msra.gmra.mrb[0].mxu0 %vm187_vm1, %v864_v7  ;;  %p903_p6 = scmp.ne.s32.totalorder %s1167_s30, %s902_s7  ;;  %p1223_p11 = scmp.ne.s32.totalorder %s1220_s21, 0 }
  0x41   : > { %750 = vmatmul.mubr.msk.bf16.vlgmr.msra.gmra.mrb[0].mxu1 %vm187_vm1, %v865_v9  ;;  %439 = vmatpush1.bf16.msra.mxu0 %v433_v13  ;;  %s974_s8 = smov [#allocation5]  }
  0x42   : > { %558 = vmatpush1.bf16.msra.mxu1 %v552_v14  ;;  %243 = vmatprep.mubr.bf16.mxu0 %v973_v0  ;;  %p904_p12 = pnand %p903_p6, %p1223_p11  ;;  %s906_s14 = sshll.u32 %s974_s8, 4  ;;  %s907_s14 = int_to_ptr.vmem [resolvable:$false] %s906_s14 }
  0x43   : > { %361 = vmatprep.mubr.bf16.mxu1 %v973_v0  ;;  %s908_s16 = scalar_lea.vmem %s907_s14, 4096  ;;  %p909_p8 = scmp.lt.s32.totalorder %s1167_s30, %s907_s14 }
  0x44   : > { %p905_p13 = pneg %p904_p12  ;;  %p910_p10 = scmp.lt.s32.totalorder %s908_s16, %s902_s7 }
  0x46   : > { %p911_p0 = por %p910_p10, %p909_p8 }
  0x48   : > { %740 = vmatmul.mubr.msk.bf16.gmra.mrb[4].mxu0 %vm187_vm1, %v866_v15  ;;  %p912_p2 = pnand %p911_p0, %p905_p13 }
  0x49   : > { %751 = vmatmul.mubr.msk.bf16.gmra.mrb[4].mxu1 %vm187_vm1, %v867_v16  ;;  %470 = vmatprep.mubr.bf16.mxu0 %v973_v0 }
  0x4a   : > { %589 = vmatprep.mubr.bf16.mxu1 %v973_v0 }
  0x50   : > { %765 = vmatmul.mubr.msk.bf16.vlgmr.msra.gmra.mrb[8].mxu0 %vm187_vm1, %v868_v17 }
  0x51   : > { %780 = vmatmul.mubr.msk.bf16.vlgmr.msra.gmra.mrb[8].mxu1 %vm187_vm1, %v869_v18  ;;  %480 = vmatprep.mubr.bf16.mxu0 %v973_v0 }
  0x52   : > { %599 = vmatprep.mubr.bf16.mxu1 %v973_v0 }
  0x58   : > { %766 = vmatmul.mubr.msk.bf16.gmra.mrb[12].mxu0 %vm187_vm1, %v870_v19 }
  0x59   : > { %781 = vmatmul.mubr.msk.bf16.gmra.mrb[12].mxu1 %vm187_vm1, %v871_v20 }
 0x113   : > { %v235_v21 = vpop.f32.mrb[0].mxu0 }
 0x114   : > { %v353_v22 = vpop.f32.mrb[0].mxu1  ;;  %v237_v23 = vpop.f32.mrb[1].mxu0 }
 0x115   : > { %v796_v24 = vpack.c.bf16 %v237_v23, %v235_v21  ;;  %v355_v25 = vpop.f32.mrb[1].mxu1  ;;  %v239_v26 = vpop.f32.mrb[2].mxu0 }
 0x116   : > { %v800_v27 = vpack.c.bf16 %v355_v25, %v353_v22  ;;  %v357_v28 = vpop.f32.mrb[2].mxu1  ;;  %v241_v29 = vpop.f32.mrb[3].mxu0 }
 0x117   : > { %278 = vst [vmem:[%s1145_s6] sm:$0xff] %v796_v24  ;;  %v797_v30 = vpack.c.bf16 %v241_v29, %v239_v26  ;;  %v359_v31 = vpop.f32.mrb[3].mxu1 }
 0x118   : > { %756 = vst [vmem:[%s1145_s6 + $0x20] sm:$0xff] %v800_v27  ;;  %v801_v32 = vpack.c.bf16 %v359_v31, %v357_v28 }
 0x119   : > { %279 = vst [vmem:[%s1145_s6 + $0x8] sm:$0xff] %v797_v30 }
 0x11a   : > { %757 = vst [vmem:[%s1145_s6 + $0x28] sm:$0xff] %v801_v32 }
 0x11b   : > { %v245_v33 = vpop.f32.mrb[4].mxu0 }
 0x11c   : > { %v363_v34 = vpop.f32.mrb[4].mxu1  ;;  %v247_v35 = vpop.f32.mrb[5].mxu0 }
 0x11d   : > { %v798_v36 = vpack.c.bf16 %v247_v35, %v245_v33  ;;  %v365_v37 = vpop.f32.mrb[5].mxu1  ;;  %v249_v38 = vpop.f32.mrb[6].mxu0 }
 0x11e   : > { %v802_v39 = vpack.c.bf16 %v365_v37, %v363_v34  ;;  %v367_v40 = vpop.f32.mrb[6].mxu1  ;;  %v251_v41 = vpop.f32.mrb[7].mxu0 }
 0x11f   : > { %280 = vst [vmem:[%s1145_s6 + $0x10] sm:$0xff] %v798_v36  ;;  %v799_v42 = vpack.c.bf16 %v251_v41, %v249_v38  ;;  %v369_v43 = vpop.f32.mrb[7].mxu1 }
 0x120   : > { %758 = vst [vmem:[%s1145_s6 + $0x30] sm:$0xff] %v802_v39  ;;  %v803_v44 = vpack.c.bf16 %v369_v43, %v367_v40 }
 0x121   : > { %281 = vst [vmem:[%s1145_s6 + $0x18] sm:$0xff] %v799_v42 }
 0x122   : > { %759 = vst [vmem:[%s1145_s6 + $0x38] sm:$0xff] %v803_v44 }
 0x123   : > { %v472_v45 = vpop.f32.mrb[8].mxu0 }
 0x124   : > { %v591_v46 = vpop.f32.mrb[8].mxu1  ;;  %v474_v47 = vpop.f32.mrb[9].mxu0 }
 0x125   : > { %v804_v48 = vpack.c.bf16 %v474_v47, %v472_v45  ;;  %v593_v49 = vpop.f32.mrb[9].mxu1  ;;  %v476_v50 = vpop.f32.mrb[10].mxu0 }
 0x126   : > { %v808_v51 = vpack.c.bf16 %v593_v49, %v591_v46  ;;  %v595_v52 = vpop.f32.mrb[10].mxu1  ;;  %v478_v53 = vpop.f32.mrb[11].mxu0 }
 0x127   : > { %771 = vst [vmem:[%s1145_s6 + $0x40] sm:$0xff] %v804_v48  ;;  %v805_v54 = vpack.c.bf16 %v478_v53, %v476_v50  ;;  %v597_v55 = vpop.f32.mrb[11].mxu1 }
 0x128   : > { %786 = vst [vmem:[%s1145_s6 + $0x60] sm:$0xff] %v808_v51  ;;  %v809_v56 = vpack.c.bf16 %v597_v55, %v595_v52 }
 0x129   : > { %772 = vst [vmem:[%s1145_s6 + $0x48] sm:$0xff] %v805_v54 }
 0x12a   : > { %787 = vst [vmem:[%s1145_s6 + $0x68] sm:$0xff] %v809_v56 }
 0x12b   : > { %v482_v57 = vpop.f32.mrb[12].mxu0 }
 0x12c   : > { %v601_v58 = vpop.f32.mrb[12].mxu1  ;;  %v484_v59 = vpop.f32.mrb[13].mxu0 }
 0x12d   : > { %v806_v60 = vpack.c.bf16 %v484_v59, %v482_v57  ;;  %v603_v61 = vpop.f32.mrb[13].mxu1  ;;  %v486_v62 = vpop.f32.mrb[14].mxu0 }
 0x12e   : > { %v810_v63 = vpack.c.bf16 %v603_v61, %v601_v58  ;;  %v605_v0 = vpop.f32.mrb[14].mxu1  ;;  %v488_v1 = vpop.f32.mrb[15].mxu0 }
 0x12f   : > { %773 = vst [vmem:[%s1145_s6 + $0x50] sm:$0xff] %v806_v60  ;;  %v807_v2 = vpack.c.bf16 %v488_v1, %v486_v62  ;;  %v607_v3 = vpop.f32.mrb[15].mxu1 }
 0x130   : > { %788 = vst [vmem:[%s1145_s6 + $0x70] sm:$0xff] %v810_v63  ;;  %v811_v4 = vpack.c.bf16 %v607_v3, %v605_v0 }
 0x131   : > { %774 = vst [vmem:[%s1145_s6 + $0x58] sm:$0xff] %v807_v2 }
 0x132   : > { %789 = vst [vmem:[%s1145_s6 + $0x78] sm:$0xff] %v811_v4 }
 0x133   : > { %915 = shalt.err (!%p912_p2)
}
 0x134   : > { %s916_s17 = scalar_lea.hbm %s1165_s4, 2048  ;;  %s920_s24 = scalar_lea.hbm %s1216_s2, 4096 }
 0x135   : > { %p917_p4 = scmp.ne.s32.totalorder %s1165_s4, %s916_s17  ;;  %p921_p9 = scmp.lt.u32.totalorder %s1165_s4, %s1216_s2 }
 0x136   : > { %p922_p1 = scmp.lt.u32.totalorder %s920_s24, %s916_s17  ;;  %p924_p6 = scmp.lt.u32.totalorder %s916_s17, %s1165_s4 }
 0x137   : > { %p918_p5 = pnand %p917_p4, %p1223_p11 }
 0x138   : > { %p923_p3 = por %p922_p1, %p921_p9 }
 0x139   : > { %p919_p7 = pneg %p918_p5 }
 0x13a   : > { %p925_p12 = por %p924_p6, %p923_p3 }
 0x13c   : > { %p926_p13 = pnand %p925_p12, %p919_p7 }
 0x13e   : > { %929 = shalt.err (!%p926_p13)
}
 0x13f   : > { %s975_s29 = smov 128   ;;  %s976_s5 = smov 8  }
 0x140   : > { %815 = dma.vmem_to_hbm [thread:$0]  (%p1223_p11), %s1167_s30, 2048, %s1165_s4, %s640_s13, %s975_s29, %s975_s29, %s976_s5  }
 0x141 PF: > { %s668_s6 = sand.u32 1, %s956_s9   ;;  %p1224_p8 = scmp.ne.s32.totalorder %s1221_s22, 0 }
 0x142   : > { %p1225_p10 = scmp.ge.s32.totalorder %s968_s12, 2  ;;  %s669_s28 = scalar_lea.sflag [#allocation4], %s668_s6 }
 0x144   : > { %p822_p0 = pnand %p1225_p10, %p1224_p8 }
 0x146   : > { %951 = dma.done.wait (!%p822_p0), %s669_s28, 2048  }
 0x147   : > { %953 = vsyncadd (!%p822_p0), %s669_s28, 4294965248  ;;  %p15_p2 = scmp.ge.s32.totalorder %s1017_s15, 4   ;;  %s1226_s9 = smov %s960_s10 }
 0x148   : > { %s1227_s10 = smov %s964_s11  ;;  %s1228_s11 = smov %s1029_s18 }
 0x149   : > { %s1229_s12 = smov %s1017_s15  ;;  %17 = sbr.rel (!%p15_p2) target bundleno = 5 (0x5), region = 79 }
 0x150   :  { %674 = vsyncpa [#allocation3], 1 }
 0x151   :  { %676 = vsyncpa [#allocation3 + $0x1], 1 }
 0x152   :  { %677 = vsyncpa [#allocation4], 1 }
 0x153   :  { %679 = vsyncpa [#allocation4 + $0x1], 1 }

</bundles_post_ra>
